<compile_context>
chip_gen: v7x
topology: tpu7x:2x2x1
jax: 0.10.0
libtpu: 0.0.40
codegen_flags: <defaults>
</compile_context>

<pallas_src>
import functools

import jax
import jax.numpy as jnp
from jax.experimental import pallas as pl
from jax.experimental.pallas import tpu as pltpu


def _round_up(x, m):
    return (x + m - 1) // m * m


def _choose_batch_tile(B, max_tile=1024):
    """Pick a batch tile (multiple of 8 sublanes) minimizing padded rows.

    Small batches: one tile covering the whole (8-padded) batch.
    Large batches: candidate tiles, preferring (least padding, even tile count for
    v7x megacore balance, then largest tile for fewest per-step overheads).
    """
    B8 = _round_up(B, 8)
    if B8 <= max_tile:
        return B8
    best_tb, best_key = None, None
    for tb in (1024, 896, 768, 640, 512, 384, 256, 128):
        if tb > max_tile:
            continue
        n_tiles = -(-B8 // tb)
        pad = n_tiles * tb - B8
        key = (pad, n_tiles % 2, -tb)
        if best_key is None or key < best_key:
            best_key, best_tb = key, tb
    return best_tb


def prepare_params(w1, b1, w2, b2):
    """One-time padding + bf16 cast of the parameters (hoisted out of the forward path).

    Padding is inert: padded hidden columns have zero w1 weight and zero bias
    (sigmoid(0)=0.5) but multiply zero w2 rows; padded D rows meet zero-padded x
    columns; padded output columns are sliced off by the wrapper.
    """
    D, H = w1.shape
    _, C = w2.shape
    D_pad, H_pad, C_pad = _round_up(D, 128), _round_up(H, 128), _round_up(C, 128)
    w1_bf = jnp.zeros((D_pad, H_pad), jnp.bfloat16).at[:D, :H].set(w1.astype(jnp.bfloat16))
    b1_p = jnp.zeros((1, H_pad), jnp.float32).at[:, :H].set(b1.astype(jnp.float32))
    w2_bf = jnp.zeros((H_pad, C_pad), jnp.bfloat16).at[:H, :C].set(w2.astype(jnp.bfloat16))
    b2_p = jnp.zeros((1, C_pad), jnp.float32).at[:, :C].set(b2.astype(jnp.float32))
    return w1_bf, b1_p, w2_bf, b2_p


def ffnn_kernel(x_ref, w1_ref, b1_ref, w2_ref, b2_ref, o_ref):
    # linear1: (TB, Dp) bf16 @ (Dp, Hp) bf16 -> f32 accumulate on the MXU
    h = jnp.dot(x_ref[...], w1_ref[...], preferred_element_type=jnp.float32)
    h = jax.nn.sigmoid(h + b1_ref[...])          # f32 VPU bias add + EUP sigmoid
    # linear2: bf16 operands, f32 accumulate; lane-dense f32 output slab
    out = jnp.dot(h.astype(jnp.bfloat16), w2_ref[...],
                  preferred_element_type=jnp.float32) + b2_ref[...]
    o_ref[...] = out.astype(o_ref.dtype)


@functools.partial(jax.jit,
                   static_argnames=("image_size", "n_channels", "max_batch_tile"))
def net_forward(x_nchw, w1_bf, b1_p, w2_bf, b2_p, *, image_size, n_channels,
                max_batch_tile=1024):
    """x_nchw: (B, C, H, W). Padded params from prepare_params().

    Returns (B, n_channels) float32, matching the PyTorch module's forward pass.
    """
    B = x_nchw.shape[0]
    D = image_size * image_size * n_channels
    C = n_channels
    D_pad, H_pad = w1_bf.shape
    C_pad = w2_bf.shape[1]

    TB = _choose_batch_tile(B, max_batch_tile)
    B_pad = _round_up(_round_up(B, 8), TB)

    # Flatten exactly like torch's x.view(-1, C*H*W); cast to bf16 first so the
    # dominant activation stream is touched once, then pad only if required.
    x_bf = x_nchw.reshape(B, D).astype(jnp.bfloat16)
    if B_pad != B or D_pad != D:
        x_bf = jnp.pad(x_bf, ((0, B_pad - B), (0, D_pad - D)))

    grid = (B_pad // TB,)

    # Double-buffered footprint (x tile, output tile) + resident weights + hidden act.
    vmem_bytes = (2 * TB * D_pad * 2
                  + 2 * TB * C_pad * 4
                  + D_pad * H_pad * 2 + H_pad * 4
                  + H_pad * C_pad * 2 + C_pad * 4
                  + TB * H_pad * 4)
    vmem_limit = int(min(64 * 1024 * 1024, max(16 * 1024 * 1024, 2 * vmem_bytes)))

    flops = 2 * B_pad * D_pad * H_pad + 2 * B_pad * H_pad * C_pad
    bytes_accessed = (B_pad * D_pad * 2 + D_pad * H_pad * 2 + H_pad * 4
                      + H_pad * C_pad * 2 + C_pad * 4 + B_pad * C_pad * 4)

    out_p = pl.pallas_call(
        ffnn_kernel,
        out_shape=jax.ShapeDtypeStruct((B_pad, C_pad), jnp.float32),
        grid=grid,
        in_specs=[
            pl.BlockSpec((TB, D_pad), lambda i: (i, 0)),     # x tile, pipelined per step
            pl.BlockSpec((D_pad, H_pad), lambda i: (0, 0)),  # w1 resident across tiles
            pl.BlockSpec((1, H_pad), lambda i: (0, 0)),      # b1 resident
            pl.BlockSpec((H_pad, C_pad), lambda i: (0, 0)),  # w2 resident
            pl.BlockSpec((1, C_pad), lambda i: (0, 0)),      # b2 resident
        ],
        out_specs=pl.BlockSpec((TB, C_pad), lambda i: (i, 0)),
        compiler_params=pltpu.CompilerParams(
            dimension_semantics=("parallel",),     # megacore sharding on v7x
            vmem_limit_bytes=vmem_limit,
        ),
        cost_estimate=pl.CostEstimate(
            flops=flops,
            transcendentals=B_pad * H_pad,         # one exp per hidden unit
            bytes_accessed=bytes_accessed,
        ),
    )(x_bf, w1_bf, b1_p, w2_bf, b2_p)

    return out_p[:B, :C]


if __name__ == "__main__":
    # Small shapes consistent with the module (defaults: hidden_size=100, n_channels=3)
    batch = 2
    image_size = 16
    n_channels = 3
    hidden_size = 100
    D = image_size * image_size * n_channels  # 768

    key = jax.random.PRNGKey(0)
    kx, kw1, kb1, kw2, kb2 = jax.random.split(key, 5)

    # Deterministic synthetic parameters, stored as (in_features, out_features)
    x = jax.random.normal(kx, (batch, n_channels, image_size, image_size), jnp.float32)
    w1 = jax.random.normal(kw1, (D, hidden_size), jnp.float32) * 0.02
    b1 = jax.random.normal(kb1, (1, hidden_size), jnp.float32) * 0.02
    w2 = jax.random.normal(kw2, (hidden_size, n_channels), jnp.float32) * 0.02
    b2 = jax.random.normal(kb2, (1, n_channels), jnp.float32) * 0.02

    # One-time parameter preparation (padding + bf16), hoisted out of the forward path.
    w1_bf, b1_p, w2_bf, b2_p = prepare_params(w1, b1, w2, b2)
    jax.block_until_ready((w1_bf, b1_p, w2_bf, b2_p))

    out = net_forward(x, w1_bf, b1_p, w2_bf, b2_p,
                      image_size=image_size, n_channels=n_channels)
    jax.block_until_ready(out)
    assert out.shape == (batch, n_channels)

    # Reference 1: same math as the kernel (bf16 MXU operands, f32 accumulate)
    x2d = x.reshape(batch, D)
    h_ref = jax.nn.sigmoid(
        jnp.dot(x2d.astype(jnp.bfloat16), w1.astype(jnp.bfloat16),
                preferred_element_type=jnp.float32) + b1)
    ref_bf = jnp.dot(h_ref.astype(jnp.bfloat16), w2.astype(jnp.bfloat16),
                     preferred_element_type=jnp.float32) + b2
    assert jnp.allclose(out, ref_bf, atol=2e-3, rtol=2e-2), "mismatch vs bf16-matched ref"

    # Reference 2: pure f32 PyTorch-equivalent forward (looser tol for bf16 operands)
    ref_f32 = jax.nn.sigmoid(x2d @ w1 + b1) @ w2 + b2
    assert jnp.allclose(out, ref_f32, atol=3e-2, rtol=3e-2), "mismatch vs f32 ref"

    print("KERNEL_OK")
</pallas_src>

<mosaic_0001>
module attributes {stable_mosaic.version = 11 : i64} {
  func.func @ffnn_kernel(%arg0: i32, %arg1: memref<8x768xbf16, #tpu.memory_space<vmem>>, %arg2: memref<768x128xbf16, #tpu.memory_space<vmem>>, %arg3: memref<1x128xf32, #tpu.memory_space<vmem>>, %arg4: memref<128x128xbf16, #tpu.memory_space<vmem>>, %arg5: memref<1x128xf32, #tpu.memory_space<vmem>>, %arg6: memref<8x128xf32, #tpu.memory_space<vmem>>) attributes {dimension_semantics = [#tpu.dimension_semantics<parallel>], iteration_bounds = array<i64: 1>, scalar_prefetch = 0 : i64, scratch_operands = 0 : i64, tpu.core_type = #tpu.core_type<tc>, window_params = [{transform_indices = @transform_0, window_bounds = array<i64: 8, 768>}, {pipeline_mode = #tpu.pipeline_mode<synchronous>, transform_indices = @transform_1, window_bounds = array<i64: 768, 128>}, {pipeline_mode = #tpu.pipeline_mode<synchronous>, transform_indices = @transform_2, window_bounds = array<i64: 1, 128>}, {pipeline_mode = #tpu.pipeline_mode<synchronous>, transform_indices = @transform_3, window_bounds = array<i64: 128, 128>}, {pipeline_mode = #tpu.pipeline_mode<synchronous>, transform_indices = @transform_4, window_bounds = array<i64: 1, 128>}, {transform_indices = @transform_5, window_bounds = array<i64: 8, 128>}]} {
    %c0 = arith.constant 0 : index
    %c0_0 = arith.constant 0 : index
    %0 = vector.load %arg1[%c0, %c0_0] : memref<8x768xbf16, #tpu.memory_space<vmem>>, vector<8x768xbf16>
    %c0_1 = arith.constant 0 : index
    %c0_2 = arith.constant 0 : index
    %1 = vector.load %arg2[%c0_1, %c0_2] : memref<768x128xbf16, #tpu.memory_space<vmem>>, vector<768x128xbf16>
    %cst = arith.constant dense<0.000000e+00> : vector<8x128xf32>
    %2 = tpu.matmul %0, %1, %cst {dimension_numbers = #tpu.dot_dimension_numbers<[1], [0], [0], [1], [0, 0, 1, 1], [], []>} : vector<8x768xbf16>, vector<768x128xbf16>, vector<8x128xf32> -> vector<8x128xf32>
    %c0_3 = arith.constant 0 : index
    %c0_4 = arith.constant 0 : index
    %3 = vector.load %arg3[%c0_3, %c0_4] : memref<1x128xf32, #tpu.memory_space<vmem>>, vector<1x128xf32>
    %4 = vector.broadcast %3 : vector<1x128xf32> to vector<8x128xf32>
    %5 = arith.addf %2, %4 : vector<8x128xf32>
    %6 = arith.negf %5 : vector<8x128xf32>
    %7 = math.exp %6 : vector<8x128xf32>
    %cst_5 = arith.constant 1.000000e+00 : f32
    %8 = vector.broadcast %cst_5 : f32 to vector<8x128xf32>
    %9 = arith.addf %8, %7 : vector<8x128xf32>
    %10 = arith.divf %8, %9 : vector<8x128xf32>
    %11 = arith.truncf %10 : vector<8x128xf32> to vector<8x128xbf16>
    %c0_6 = arith.constant 0 : index
    %c0_7 = arith.constant 0 : index
    %12 = vector.load %arg4[%c0_6, %c0_7] : memref<128x128xbf16, #tpu.memory_space<vmem>>, vector<128x128xbf16>
    %cst_8 = arith.constant dense<0.000000e+00> : vector<8x128xf32>
    %13 = tpu.matmul %11, %12, %cst_8 {dimension_numbers = #tpu.dot_dimension_numbers<[1], [0], [0], [1], [0, 0, 1, 1], [], []>} : vector<8x128xbf16>, vector<128x128xbf16>, vector<8x128xf32> -> vector<8x128xf32>
    %c0_9 = arith.constant 0 : index
    %c0_10 = arith.constant 0 : index
    %14 = vector.load %arg5[%c0_9, %c0_10] : memref<1x128xf32, #tpu.memory_space<vmem>>, vector<1x128xf32>
    %15 = vector.broadcast %14 : vector<1x128xf32> to vector<8x128xf32>
    %16 = arith.addf %13, %15 : vector<8x128xf32>
    %c0_11 = arith.constant 0 : index
    %c0_12 = arith.constant 0 : index
    %17 = vector.load %arg6[%c0_11, %c0_12] : memref<8x128xf32, #tpu.memory_space<vmem>>, vector<8x128xf32>
    tpu.vector_store %arg6[%c0_11, %c0_12], %16 {strides = array<i32>} : memref<8x128xf32, #tpu.memory_space<vmem>>, vector<8x128xf32>,
    return
  }
  func.func @transform_0(%arg0: i32) -> (i32, i32) {
    %c0_i32 = arith.constant 0 : i32
    %c0_i32_0 = arith.constant 0 : i32
    return %arg0, %c0_i32 : i32, i32
  }
  func.func @transform_1(%arg0: i32) -> (i32, i32) {
    %c0_i32 = arith.constant 0 : i32
    %c0_i32_0 = arith.constant 0 : i32
    %c0_i32_1 = arith.constant 0 : i32
    return %c0_i32, %c0_i32_0 : i32, i32
  }
  func.func @transform_2(%arg0: i32) -> (i32, i32) {
    %c0_i32 = arith.constant 0 : i32
    %c0_i32_0 = arith.constant 0 : i32
    %c0_i32_1 = arith.constant 0 : i32
    return %c0_i32, %c0_i32_0 : i32, i32
  }
  func.func @transform_3(%arg0: i32) -> (i32, i32) {
    %c0_i32 = arith.constant 0 : i32
    %c0_i32_0 = arith.constant 0 : i32
    %c0_i32_1 = arith.constant 0 : i32
    return %c0_i32, %c0_i32_0 : i32, i32
  }
  func.func @transform_4(%arg0: i32) -> (i32, i32) {
    %c0_i32 = arith.constant 0 : i32
    %c0_i32_0 = arith.constant 0 : i32
    %c0_i32_1 = arith.constant 0 : i32
    return %c0_i32, %c0_i32_0 : i32, i32
  }
  func.func @transform_5(%arg0: i32) -> (i32, i32) {
    %c0_i32 = arith.constant 0 : i32
    %c0_i32_0 = arith.constant 0 : i32
    return %arg0, %c0_i32 : i32, i32
  }
}

</mosaic_0001>

<bundles_post_ra>
// kernel: net_forward.1
= control target key start
LH: loop header
LB: loop body
LE: loop exit
PB: predicated region body
PF: predicated region fallthrough
CT: control target
= control target key end

     0   :  { %10 = vsyncpa [#allocation3], 0  ;;  %s949_s18 = smov [#allocation2]   ;;  %s1038_s0 = inlined_call_operand.vmem [shape: bf16[8,768], index: 0, kind: input, shape index: {}]   ;;  %s1039_s1 = inlined_call_operand.hbm [shape: bf16[768,128], index: 1, kind: input, shape index: {}]   ;;  %s1040_s2 = inlined_call_operand.vmem [shape: f32[1,128], index: 2, kind: input, shape index: {}]   ;;  %s1041_s3 = inlined_call_operand.vmem [shape: bf16[128,128], index: 3, kind: input, shape index: {}]   ;;  %s1042_s4 = inlined_call_operand.vmem [shape: f32[1,128], index: 4, kind: input, shape index: {}]   ;;  %s1043_s5 = inlined_call_operand.vmem [shape: f32[8,128], index: 5, kind: output, shape index: {}]  }
   0x1   :  { %s18_s19 = sshll.u32 %s949_s18, 4  ;;  %s925_s22 = scalar_lea.hbm %s1039_s1, 6144  ;;  %s19_s19 = int_to_ptr.vmem [resolvable:$true] %s18_s19 }
   0x2   :  { %p926_p0 = scmp.ne.s32.totalorder %s1039_s1, %s925_s22  ;;  %p929_p1 = scmp.lt.u32.totalorder %s925_s22, %s1039_s1 }
   0x4   :  { %p931_p2 = pnand %p929_p1, %p926_p0 }
   0x6   :  { %934 = shalt.err (!%p931_p2)
}
   0x7   :  { %s935_s27 = scalar_lea.vmem %s19_s19, 6144  ;;  %p940_p4 = scmp.lt.s32.totalorder %s19_s19, %s19_s19 }
   0x8   :  { %p936_p3 = scmp.ne.s32.totalorder %s19_s19, %s935_s27  ;;  %p941_p5 = scmp.lt.s32.totalorder %s935_s27, %s935_s27 }
   0xa   :  { %p942_p6 = por %p941_p5, %p940_p4 }
   0xc   :  { %p943_p7 = pnand %p942_p6, %p936_p3 }
   0xe   :  { %946 = shalt.err (!%p943_p7)
}
   0xf   :  { %s950_s28 = smov 64   ;;  %s951_s29 = smov 4  }
  0x10   :  { %24 = dma.hbm_to_vmem [thread:$0]  %s1039_s1, 6144, %s19_s19, [#allocation3], %s950_s28, %s950_s28, %s951_s29  }
  0x11   :  { %947 = dma.done.wait [#allocation3], 6144  }
  0x12   :  { %948 = vsyncadd [#allocation3], 4294961152  ;;  %v859_v0 = vld [vmem:[#allocation2 + $0x40] sm:$0xff]   ;;  %v863_v4 = vld [vmem:[#allocation2 + $0x48] sm:$0xff]   ;;  %v952_v58 = vmov 0.0   ;;  %vm953_vm0 = vmmov 0  }
  0x13   :  { %v860_v1 = vld [vmem:[#allocation2] sm:$0xff]   ;;  %759 = vmatprep.subr.bf16.mxu0 %v859_v0  ;;  %v864_v5 = vld [vmem:[#allocation2 + $0x8] sm:$0xff]   ;;  %v867_v8 = vld [vmem:[#allocation2 + $0x50] sm:$0xff]  }
  0x14   :  { %v861_v2 = vld [vmem:[#allocation2 + $0xc0] sm:$0xff]   ;;  %760 = vmatpush3.bf16.msra.mxu0 %v860_v1  ;;  %v865_v6 = vld [vmem:[#allocation2 + $0xc8] sm:$0xff]   ;;  %v868_v9 = vld [vmem:[#allocation2 + $0x10] sm:$0xff]  }
  0x15   :  { %v862_v3 = vld [vmem:[#allocation2 + $0x80] sm:$0xff]   ;;  %781 = vmatprep.subr.bf16.mxu1 %v861_v2  ;;  %761 = vmatprep.subr.bf16.mxu0 %v863_v4  ;;  %v866_v7 = vld [vmem:[#allocation2 + $0x88] sm:$0xff]   ;;  %v869_v10 = vld [vmem:[#allocation2 + $0xd0] sm:$0xff]  }
  0x16   :  { %782 = vmatpush3.bf16.msra.mxu1 %v862_v3  ;;  %v870_v11 = vld [vmem:[#allocation2 + $0x90] sm:$0xff]   ;;  %v871_v12 = vld [vmem:[#allocation2 + $0x58] sm:$0xff]   ;;  %v875_v16 = vld [vmem:[#allocation2 + $0x60] sm:$0xff]  }
  0x17   :  { %783 = vmatprep.subr.bf16.mxu1 %v865_v6  ;;  %v872_v13 = vld [vmem:[#allocation2 + $0x18] sm:$0xff]   ;;  %v876_v17 = vld [vmem:[#allocation2 + $0x20] sm:$0xff]   ;;  %v879_v20 = vld [vmem:[#allocation2 + $0x68] sm:$0xff]  }
  0x18   :  { %762 = vmatpush3.bf16.msra.mxu0 %v864_v5  ;;  %v873_v14 = vld [vmem:[#allocation2 + $0xd8] sm:$0xff]   ;;  %v877_v18 = vld [vmem:[#allocation2 + $0xe0] sm:$0xff]   ;;  %v880_v21 = vld [vmem:[#allocation2 + $0x28] sm:$0xff]  }
  0x19   :  { %763 = vmatprep.subr.bf16.mxu0 %v867_v8  ;;  %v874_v15 = vld [vmem:[#allocation2 + $0x98] sm:$0xff]   ;;  %v878_v19 = vld [vmem:[#allocation2 + $0xa0] sm:$0xff]   ;;  %v881_v22 = vld [vmem:[#allocation2 + $0xe8] sm:$0xff]  }
  0x1a   :  { %784 = vmatpush3.bf16.msra.mxu1 %v866_v7  ;;  %v882_v23 = vld [vmem:[#allocation2 + $0xa8] sm:$0xff]   ;;  %v883_v24 = vld [vmem:[#allocation2 + $0x70] sm:$0xff]   ;;  %v887_v28 = vld [vmem:[#allocation2 + $0x78] sm:$0xff]  }
  0x1b   :  { %785 = vmatprep.subr.bf16.mxu1 %v869_v10  ;;  %v884_v25 = vld [vmem:[#allocation2 + $0x30] sm:$0xff]   ;;  %v888_v29 = vld [vmem:[#allocation2 + $0x38] sm:$0xff]   ;;  %v35_v31 = vld [vmem:[%s1038_s0] sm:$0xff] }
  0x1c   :  { %764 = vmatpush3.bf16.msra.mxu0 %v868_v9  ;;  %v885_v26 = vld [vmem:[#allocation2 + $0xf0] sm:$0xff]   ;;  %v889_v30 = vld [vmem:[#allocation2 + $0xf8] sm:$0xff]   ;;  %v695_v32 = vcombine.low %v35_v31, %v35_v31  ;;  %v696_v33 = vcombine.high %v35_v31, %v35_v31  ;;  %v893_v35 = vld [vmem:[#allocation2 + $0x140] sm:$0xff]  }
  0x1d   :  { %765 = vmatprep.subr.bf16.mxu0 %v871_v12  ;;  %v886_v27 = vld [vmem:[#allocation2 + $0xb0] sm:$0xff]   ;;  %v892_v34 = vld [vmem:[#allocation2 + $0xb8] sm:$0xff]   ;;  %v36_v36 = vld [vmem:[%s1038_s0 + $0x8] sm:$0xff] }
  0x1e   :  { %786 = vmatpush3.bf16.msra.mxu1 %v870_v11  ;;  %482 = vmatprep.mubr.bf16.mxu0 %v696_v33  ;;  %v697_v37 = vcombine.low %v36_v36, %v36_v36  ;;  %v698_v38 = vcombine.high %v36_v36, %v36_v36  ;;  %v896_v39 = vld [vmem:[#allocation2 + $0x100] sm:$0xff]   ;;  %v897_v40 = vld [vmem:[#allocation2 + $0x148] sm:$0xff]   ;;  %v899_v42 = vld [vmem:[#allocation2 + $0x150] sm:$0xff]  }
  0x1f   :  { %787 = vmatprep.subr.bf16.mxu1 %v873_v14  ;;  %v898_v41 = vld [vmem:[#allocation2 + $0x108] sm:$0xff]   ;;  %v900_v43 = vld [vmem:[#allocation2 + $0x110] sm:$0xff]   ;;  %v901_v44 = vld [vmem:[#allocation2 + $0x158] sm:$0xff]  }
  0x20   :  { %766 = vmatpush3.bf16.msra.mxu0 %v872_v13  ;;  %522 = vmatprep.mubr.bf16.mxu1 %v698_v38  ;;  %v902_v45 = vld [vmem:[#allocation2 + $0x118] sm:$0xff]   ;;  %v903_v46 = vld [vmem:[#allocation2 + $0x160] sm:$0xff]   ;;  %v905_v48 = vld [vmem:[#allocation2 + $0x168] sm:$0xff]  }
  0x21   :  { %767 = vmatprep.subr.bf16.mxu0 %v875_v16  ;;  %v904_v47 = vld [vmem:[#allocation2 + $0x120] sm:$0xff]   ;;  %v37_v49 = vld [vmem:[%s1038_s0 + $0x10] sm:$0xff]  ;;  %v906_v51 = vld [vmem:[#allocation2 + $0x128] sm:$0xff]  }
  0x22   :  { %788 = vmatpush3.bf16.msra.mxu1 %v874_v15  ;;  %v700_v50 = vcombine.high %v37_v49, %v37_v49  ;;  %v907_v52 = vld [vmem:[#allocation2 + $0x170] sm:$0xff]   ;;  %v909_v54 = vld [vmem:[#allocation2 + $0x178] sm:$0xff]   ;;  %v699_v56 = vcombine.low %v37_v49, %v37_v49  ;;  %v913_v57 = vld [vmem:[%s1041_s3] sm:$0xff]  }
  0x23   :  { %789 = vmatprep.subr.bf16.mxu1 %v877_v18  ;;  %v908_v53 = vld [vmem:[#allocation2 + $0x130] sm:$0xff]   ;;  %v910_v55 = vld [vmem:[#allocation2 + $0x138] sm:$0xff]   ;;  %v914_v59 = vld [vmem:[%s1041_s3 + $0x8] sm:$0xff]  }
  0x24   :  { %768 = vmatpush3.bf16.msra.mxu0 %v876_v17  ;;  %v915_v60 = vld [vmem:[%s1041_s3 + $0x10] sm:$0xff]   ;;  %v916_v61 = vld [vmem:[%s1041_s3 + $0x18] sm:$0xff]   ;;  %v917_v62 = vld [vmem:[%s1041_s3 + $0x20] sm:$0xff]  }
  0x25   :  { %769 = vmatprep.subr.bf16.mxu0 %v879_v20  ;;  %v918_v63 = vld [vmem:[%s1041_s3 + $0x28] sm:$0xff]   ;;  %v919_v0 = vld [vmem:[%s1041_s3 + $0x30] sm:$0xff]   ;;  %v920_v1 = vld [vmem:[%s1041_s3 + $0x38] sm:$0xff]  }
  0x26   :  { %790 = vmatpush3.bf16.msra.mxu1 %v878_v19  ;;  %v694_v3 = vld [vmem:[%s1040_s2] ss:$0 sm:$0xff] }
  0x27   :  { %791 = vmatprep.subr.bf16.mxu1 %v881_v22 }
  0x28   :  { %770 = vmatpush3.bf16.msra.mxu0 %v880_v21 }
  0x29   :  { %771 = vmatprep.subr.bf16.mxu0 %v883_v24 }
  0x2a   :  { %792 = vmatpush3.bf16.msra.mxu1 %v882_v23 }
  0x2b   :  { %793 = vmatprep.subr.bf16.mxu1 %v885_v26  ;;  %v750_v26 = vld [vmem:[%s1042_s4] ss:$0 sm:$0xff] }
  0x2c   :  { %772 = vmatpush3.bf16.msra.mxu0 %v884_v25 }
  0x2d   :  { %773 = vmatprep.subr.bf16.mxu0 %v887_v28 }
  0x2e   :  { %794 = vmatpush3.bf16.msra.mxu1 %v886_v27 }
  0x2f   :  { %795 = vmatprep.subr.bf16.mxu1 %v889_v30 }
  0x30   :  { %774 = vmatpush3.bf16.msra.mxu0 %v888_v29 }
  0x31   :  { %803 = vmatprep.subr.bf16.mxu0 %v893_v35 }
  0x32   :  { %796 = vmatpush3.bf16.msra.mxu1 %v892_v34 }
  0x33   :  { %483 = vmatmul.mubr.bf16.vlgmr.msra.gmra.mrb[0].mxu0 %v695_v32  ;;  %834 = vmatprep.subr.bf16.mxu1 %v952_v58 }
  0x34   :  { %804 = vmatpush3.bf16.msra.mxu0 %v896_v39  ;;  %562 = vmatprep.mubr.bf16.mxu0 %v700_v50 }
  0x35   :  { %523 = vmatmul.mubr.bf16.vlgmr.msra.gmra.mrb[0].mxu1 %v697_v37  ;;  %805 = vmatprep.subr.bf16.mxu0 %v897_v40 }
  0x36   :  { %835 = vmatpush3.bf16.msra.mxu1 %v913_v57  ;;  %850 = vmatprep.mubr.msk.bf16.mxu1 %vm953_vm0, %v952_v58 }
  0x37   :  { %836 = vmatprep.subr.bf16.mxu1 %v952_v58 }
  0x38   :  { %806 = vmatpush3.bf16.msra.mxu0 %v898_v41 }
  0x39   :  { %807 = vmatprep.subr.bf16.mxu0 %v899_v42 }
  0x3a   :  { %837 = vmatpush3.bf16.msra.mxu1 %v914_v59 }
  0x3b   :  { %838 = vmatprep.subr.bf16.mxu1 %v952_v58 }
  0x3c   :  { %808 = vmatpush3.bf16.msra.mxu0 %v900_v43 }
  0x3d   :  { %809 = vmatprep.subr.bf16.mxu0 %v901_v44 }
  0x3e   :  { %839 = vmatpush3.bf16.msra.mxu1 %v915_v60 }
  0x3f   :  { %840 = vmatprep.subr.bf16.mxu1 %v952_v58 }
  0x40   :  { %810 = vmatpush3.bf16.msra.mxu0 %v902_v45 }
  0x41   :  { %811 = vmatprep.subr.bf16.mxu0 %v903_v46 }
  0x42   :  { %841 = vmatpush3.bf16.msra.mxu1 %v916_v61 }
  0x43   :  { %842 = vmatprep.subr.bf16.mxu1 %v952_v58 }
  0x44   :  { %812 = vmatpush3.bf16.msra.mxu0 %v904_v47 }
  0x45   :  { %813 = vmatprep.subr.bf16.mxu0 %v905_v48 }
  0x46   :  { %843 = vmatpush3.bf16.msra.mxu1 %v917_v62 }
  0x47   :  { %844 = vmatprep.subr.bf16.mxu1 %v952_v58 }
  0x48   :  { %814 = vmatpush3.bf16.msra.mxu0 %v906_v51 }
  0x49   :  { %815 = vmatprep.subr.bf16.mxu0 %v907_v52 }
  0x4a   :  { %845 = vmatpush3.bf16.msra.mxu1 %v918_v63 }
  0x4b   :  { %846 = vmatprep.subr.bf16.mxu1 %v952_v58 }
  0x4c   :  { %816 = vmatpush3.bf16.msra.mxu0 %v908_v53 }
  0x4d   :  { %817 = vmatprep.subr.bf16.mxu0 %v909_v54 }
  0x4e   :  { %847 = vmatpush3.bf16.msra.mxu1 %v919_v0 }
  0x4f   :  { %848 = vmatprep.subr.bf16.mxu1 %v952_v58 }
  0x50   :  { %818 = vmatpush3.bf16.msra.mxu0 %v910_v55 }
  0x52   :  { %849 = vmatpush3.bf16.msra.mxu1 %v920_v1 }
  0x53   :  { %563 = vmatmul.mubr.bf16.vlgmr.msra.gmra.mrb[4].mxu0 %v699_v56 }
 0x106   :  { %v775_v2 = vpop.f32.mrb[0].mxu0 }
 0x107   :  { %v776_v4 = vpop.f32.mrb[1].mxu0 }
 0x108   :  { %v777_v5 = vadd.f32 %v776_v4, %v775_v2  ;;  %v778_v6 = vpop.f32.mrb[2].mxu0  ;;  %v797_v7 = vpop.f32.mrb[0].mxu1 }
 0x109   :  { %v779_v8 = vpop.f32.mrb[3].mxu0  ;;  %v798_v9 = vpop.f32.mrb[1].mxu1 }
 0x10a   :  { %v485_v10 = vadd.f32 %v777_v5, %v694_v3  ;;  %v799_v11 = vadd.f32 %v798_v9, %v797_v7  ;;  %v800_v12 = vpop.f32.mrb[2].mxu1 }
 0x10b   :  { %v801_v13 = vpop.f32.mrb[3].mxu1 }
 0x10c   :  { %v525_v14 = vadd.f32 %v799_v11, %v485_v10 }
 0x126   :  { %v819_v15 = vpop.f32.mrb[4].mxu0 }
 0x127   :  { %v820_v16 = vpop.f32.mrb[5].mxu0 }
 0x128   :  { %v821_v17 = vadd.f32 %v820_v16, %v819_v15  ;;  %v822_v18 = vpop.f32.mrb[6].mxu0 }
 0x129   :  { %v823_v19 = vpop.f32.mrb[7].mxu0 }
 0x12a   :  { %v565_v20 = vadd.f32 %v821_v17, %v525_v14 }
 0x12c   :  { %v749_v21 = vmul.f32 -1.442695, %v565_v20 }
 0x12e   :  { %921 = vpow2.f32 %v749_v21 }
 0x138   :  { %v922_v22 = vpop.eup %921 }
 0x139   :  { %v573_v23 = vadd.f32 1.0, %v922_v22 }
 0x13b   :  { %923 = vrcp.f32 %v573_v23 }
 0x145   :  { %v924_v24 = vpop.eup %923 }
 0x146   :  { %v576_v25 = vpack.c.bf16 %v924_v24, %v924_v24 }
 0x148   :  { %851 = vmatmul.mubr.bf16.vlgmr.msra.gmra.mrb[4].mxu1 %v576_v25 }
 0x21b   :  { %v682_v27 = vpop.f32.mrb[4].mxu1 }
 0x21c   :  { %v683_v28 = vadd.f32 %v750_v26, %v682_v27  ;;  %v852_v29 = vpop.f32.mrb[5].mxu1 }
 0x21d   :  { %v685_v30 = vpop.f32.mrb[6].mxu1 }
 0x21e   :  { %688 = vst [vmem:[%s1043_s5] sm:$0xff] %v683_v28  ;;  %v853_v31 = vpop.f32.mrb[7].mxu1 }
 0x21f   :  { %693 = vsyncpa [#allocation3], 1 }

</bundles_post_ra>
